<compile_context>
chip_gen: v5e
topology: v5e:2x2
jax: 0.10.0
libtpu: 0.0.40
codegen_flags: <defaults>
</compile_context>

<pallas_src>
import functools

import jax
import jax.numpy as jnp
from jax.experimental import pallas as pl
from jax.experimental.pallas import tpu as pltpu


def _block_kernel(*refs, act_fn, dropout, residual, training, eps):
    it = iter(refs)
    x_ref = next(it)                                  # (N, H)  resident
    xcol_ref = next(it) if residual else None         # (N, tn) this tile's x cols
    w_ref = next(it)                                  # (H, tn) streamed weights
    g_ref = next(it)                                  # (1, tn) BN gamma
    beta_ref = next(it)                               # (1, tn) BN beta
    use_dropout = training and dropout > 0.0
    u_ref = next(it) if use_dropout else None         # (N, tn) uniform [0,1)
    o_ref = next(it)                                  # (N, tn) output tile

    # ---- Linear (MXU, native input dtype, f32 accumulation) -----------------
    # Linear bias intentionally omitted: training-mode BN's mean subtraction
    # cancels any per-column constant, so y+b and y give identical BN output.
    y = jnp.dot(x_ref[...], w_ref[...], preferred_element_type=jnp.float32)

    # ---- BatchNorm1d (training mode: batch stats, biased variance) ----------
    n = y.shape[0]
    inv_n = 1.0 / n
    mean = jnp.sum(y, axis=0, keepdims=True) * inv_n            # (1, tn)
    d = y - mean
    var = jnp.sum(d * d, axis=0, keepdims=True) * inv_n          # biased, f32
    scale = g_ref[...].astype(jnp.float32) * jax.lax.rsqrt(var + eps)
    shift = beta_ref[...].astype(jnp.float32) - mean * scale

    if use_dropout:
        # Fold inverted-dropout 1/keep into the (1, tn) scale/shift; legal
        # because ReLU / LeakyReLU commute with a positive scale.
        inv_keep = 1.0 / (1.0 - dropout)
        scale = scale * inv_keep
        shift = shift * inv_keep

    y = y * scale + shift                                        # (N, tn)

    # ---- Activation ----------------------------------------------------------
    if act_fn == 'relu':
        y = jnp.maximum(y, 0.0)
    elif act_fn == 'leakyrelu':
        y = jnp.maximum(y, 0.01 * y)
    else:
        raise ValueError(act_fn)

    # ---- Dropout mask (inverted; rescale already folded in above) -----------
    if use_dropout:
        keep = 1.0 - dropout
        y = jnp.where(u_ref[...] < keep, y, 0.0)

    # ---- Residual -------------------------------------------------------------
    if residual:
        y = y + xcol_ref[...].astype(jnp.float32)

    o_ref[...] = y.astype(o_ref.dtype)


def block_forward(x, w_t, b, gamma, beta, *, act_fn='relu', dropout=0.0,
                  use_bias=True, residual=True, training=True, eps=1e-5,
                  rng_key=None, tn=None):
    """x: (N, H); w_t: (H_in, H_out) already transposed so y = x @ w_t.

    `b` / `use_bias` are accepted for API parity with the PyTorch module but
    the bias is a mathematical no-op under training-mode BatchNorm and is not
    used by the kernel.
    """
    del b, use_bias  # no-op under training-mode BN (mean subtraction cancels it)
    N, H = x.shape

    # Column tile: largest of {512, 256, 128} that divides H, else the full H
    # (small / toy hidden sizes run as a single full-array block).
    if tn is None:
        tn = H
        for cand in (512, 256, 128):
            if H % cand == 0:
                tn = cand
                break
    assert H % tn == 0, (H, tn)
    num_tiles = H // tn

    use_dropout = training and dropout > 0.0
    g2 = gamma.reshape(1, H)
    be2 = beta.reshape(1, H)

    in_specs = [pl.BlockSpec((N, H), lambda j: (0, 0))]    # x: resident
    args = [x]
    if residual:
        in_specs.append(pl.BlockSpec((N, tn), lambda j: (0, j)))   # x col tile
        args.append(x)
    in_specs += [
        pl.BlockSpec((H, tn), lambda j: (0, j)),           # weight col tile
        pl.BlockSpec((1, tn), lambda j: (0, j)),           # gamma
        pl.BlockSpec((1, tn), lambda j: (0, j)),           # beta
    ]
    args += [w_t, g2, be2]
    if use_dropout:
        if rng_key is None:
            rng_key = jax.random.PRNGKey(0)
        u = jax.random.uniform(rng_key, (N, H), dtype=jnp.float32)
        in_specs.append(pl.BlockSpec((N, tn), lambda j: (0, j)))
        args.append(u)

    kernel = functools.partial(
        _block_kernel, act_fn=act_fn, dropout=dropout,
        residual=residual, training=training, eps=eps)

    cost = pl.CostEstimate(
        flops=2 * N * H * H,
        transcendentals=0,
        bytes_accessed=4 * (H * H + 4 * N * H))

    return pl.pallas_call(
        kernel,
        out_shape=jax.ShapeDtypeStruct((N, H), x.dtype),
        grid=(num_tiles,),
        in_specs=in_specs,
        out_specs=pl.BlockSpec((N, tn), lambda j: (0, j)),
        compiler_params=pltpu.CompilerParams(
            dimension_semantics=("parallel",)),
        cost_estimate=cost,
    )(*args)


def _ref_forward(x, w_t, b, gamma, beta, *, act_fn, use_bias, residual, eps=1e-5):
    """Pure-JAX reference (dropout disabled), mirrors the PyTorch module."""
    y = x @ w_t + (b[None, :] if use_bias else 0.0)
    mean = y.mean(0, keepdims=True)
    var = ((y - mean) ** 2).mean(0, keepdims=True)
    y = (y - mean) / jnp.sqrt(var + eps) * gamma[None, :] + beta[None, :]
    y = jnp.maximum(y, 0.0) if act_fn == 'relu' else jnp.where(y > 0, y, 0.01 * y)
    return x + y if residual else y


if __name__ == "__main__":
    key = jax.random.PRNGKey(0)
    k1, k2, k3, k4, k5, k6 = jax.random.split(key, 6)

    # ---- Small shape consistent with the module: batch=8, hidden_dim=32 -----
    N, H = 8, 32
    x = jax.random.normal(k1, (N, H), dtype=jnp.float32)
    w_pt = jax.random.normal(k2, (H, H), dtype=jnp.float32) * (1.0 / jnp.sqrt(H))
    w_t = w_pt.T
    b = 0.1 * jax.random.normal(k3, (H,), dtype=jnp.float32)
    gamma = 1.0 + 0.1 * jax.random.normal(k4, (H,), dtype=jnp.float32)
    beta = 0.1 * jax.random.normal(k5, (H,), dtype=jnp.float32)

    # Correctness vs pure-JAX reference (dropout p=0), leakyrelu + residual.
    out_nodrop = block_forward(x, w_t, b, gamma, beta,
                               act_fn='leakyrelu', dropout=0.0,
                               use_bias=True, residual=True, training=True)
    ref = _ref_forward(x, w_t, b, gamma, beta,
                       act_fn='leakyrelu', use_bias=True, residual=True)
    jax.block_until_ready(out_nodrop)
    assert jnp.allclose(out_nodrop, ref, atol=1e-4, rtol=1e-4), "mismatch vs ref (small)"

    # Full training-mode forward (dropout active, deterministic per key).
    out_drop = block_forward(x, w_t, b, gamma, beta,
                             act_fn='relu', dropout=0.1,
                             use_bias=True, residual=True, training=True,
                             rng_key=k6)
    jax.block_until_ready(out_drop)
    assert out_drop.shape == (N, H) and out_drop.dtype == jnp.float32
    assert bool(jnp.all(jnp.isfinite(out_drop)))

    # ---- Larger shape exercising the multi-tile (pipelined) path ------------
    N2, H2 = 16, 256
    x2 = jax.random.normal(k1, (N2, H2), dtype=jnp.float32)
    w2 = jax.random.normal(k2, (H2, H2), dtype=jnp.float32) * (1.0 / jnp.sqrt(H2))
    w2_t = w2.T
    b2 = 0.1 * jax.random.normal(k3, (H2,), dtype=jnp.float32)
    g2 = 1.0 + 0.1 * jax.random.normal(k4, (H2,), dtype=jnp.float32)
    be2 = 0.1 * jax.random.normal(k5, (H2,), dtype=jnp.float32)

    out2 = block_forward(x2, w2_t, b2, g2, be2,
                         act_fn='relu', dropout=0.0,
                         use_bias=True, residual=True, training=True,
                         tn=128)                       # grid=(2,), tiled path
    ref2 = _ref_forward(x2, w2_t, b2, g2, be2,
                        act_fn='relu', use_bias=True, residual=True)
    jax.block_until_ready(out2)
    assert jnp.allclose(out2, ref2, atol=1e-4, rtol=1e-4), "mismatch vs ref (tiled)"

    out2d = block_forward(x2, w2_t, b2, g2, be2,
                          act_fn='leakyrelu', dropout=0.2,
                          use_bias=True, residual=False, training=True,
                          rng_key=k6, tn=128)
    jax.block_until_ready(out2d)
    assert out2d.shape == (N2, H2) and bool(jnp.all(jnp.isfinite(out2d)))

    print("KERNEL_OK")
</pallas_src>

<mosaic_0001>
module attributes {stable_mosaic.version = 11 : i64} {
  func.func @_block_kernel(%arg0: i32, %arg1: memref<8x32xf32, #tpu.memory_space<vmem>>, %arg2: memref<8x32xf32, #tpu.memory_space<vmem>>, %arg3: memref<32x32xf32, #tpu.memory_space<vmem>>, %arg4: memref<1x32xf32, #tpu.memory_space<vmem>>, %arg5: memref<1x32xf32, #tpu.memory_space<vmem>>, %arg6: memref<8x32xf32, #tpu.memory_space<vmem>>) attributes {dimension_semantics = [#tpu.dimension_semantics<parallel>], iteration_bounds = array<i64: 1>, scalar_prefetch = 0 : i64, scratch_operands = 0 : i64, tpu.core_type = #tpu.core_type<tc>, window_params = [{pipeline_mode = #tpu.pipeline_mode<synchronous>, transform_indices = @transform_0, window_bounds = array<i64: 8, 32>}, {transform_indices = @transform_1, window_bounds = array<i64: 8, 32>}, {transform_indices = @transform_2, window_bounds = array<i64: 32, 32>}, {transform_indices = @transform_3, window_bounds = array<i64: 1, 32>}, {transform_indices = @transform_4, window_bounds = array<i64: 1, 32>}, {transform_indices = @transform_5, window_bounds = array<i64: 8, 32>}]} {
    %c0 = arith.constant 0 : index
    %c0_0 = arith.constant 0 : index
    %0 = vector.load %arg1[%c0, %c0_0] : memref<8x32xf32, #tpu.memory_space<vmem>>, vector<8x32xf32>
    %c0_1 = arith.constant 0 : index
    %c0_2 = arith.constant 0 : index
    %1 = vector.load %arg3[%c0_1, %c0_2] : memref<32x32xf32, #tpu.memory_space<vmem>>, vector<32x32xf32>
    %cst = arith.constant dense<0.000000e+00> : vector<8x32xf32>
    %2 = tpu.matmul %0, %1, %cst {dimension_numbers = #tpu.dot_dimension_numbers<[1], [0], [0], [1], [0, 0, 1, 1], [], []>} : vector<8x32xf32>, vector<32x32xf32>, vector<8x32xf32> -> vector<8x32xf32>
    %cst_3 = arith.constant dense<0.000000e+00> : vector<32xf32>
    %3 = vector.multi_reduction <add>, %2, %cst_3 [0] : vector<8x32xf32> to vector<32xf32>
    %4 = vector.shape_cast %3 : vector<32xf32> to vector<1x32xf32>
    %cst_4 = arith.constant 1.250000e-01 : f32
    %5 = vector.broadcast %cst_4 : f32 to vector<1x32xf32>
    %6 = arith.mulf %4, %5 : vector<1x32xf32>
    %7 = vector.broadcast %6 : vector<1x32xf32> to vector<8x32xf32>
    %8 = arith.subf %2, %7 : vector<8x32xf32>
    %9 = arith.mulf %8, %8 : vector<8x32xf32>
    %cst_5 = arith.constant dense<0.000000e+00> : vector<32xf32>
    %10 = vector.multi_reduction <add>, %9, %cst_5 [0] : vector<8x32xf32> to vector<32xf32>
    %11 = vector.shape_cast %10 : vector<32xf32> to vector<1x32xf32>
    %cst_6 = arith.constant 1.250000e-01 : f32
    %12 = vector.broadcast %cst_6 : f32 to vector<1x32xf32>
    %13 = arith.mulf %11, %12 : vector<1x32xf32>
    %c0_7 = arith.constant 0 : index
    %c0_8 = arith.constant 0 : index
    %14 = vector.load %arg4[%c0_7, %c0_8] : memref<1x32xf32, #tpu.memory_space<vmem>>, vector<1x32xf32>
    %cst_9 = arith.constant 9.99999974E-6 : f32
    %15 = vector.broadcast %cst_9 : f32 to vector<1x32xf32>
    %16 = arith.addf %13, %15 : vector<1x32xf32>
    %17 = math.rsqrt %16 : vector<1x32xf32>
    %18 = arith.mulf %14, %17 : vector<1x32xf32>
    %c0_10 = arith.constant 0 : index
    %c0_11 = arith.constant 0 : index
    %19 = vector.load %arg5[%c0_10, %c0_11] : memref<1x32xf32, #tpu.memory_space<vmem>>, vector<1x32xf32>
    %20 = arith.mulf %6, %18 : vector<1x32xf32>
    %21 = arith.subf %19, %20 : vector<1x32xf32>
    %22 = vector.broadcast %18 : vector<1x32xf32> to vector<8x32xf32>
    %23 = arith.mulf %2, %22 : vector<8x32xf32>
    %24 = vector.broadcast %21 : vector<1x32xf32> to vector<8x32xf32>
    %25 = arith.addf %23, %24 : vector<8x32xf32>
    %cst_12 = arith.constant 0.00999999977 : f32
    %26 = vector.broadcast %cst_12 : f32 to vector<8x32xf32>
    %27 = arith.mulf %26, %25 : vector<8x32xf32>
    %28 = arith.maximumf %25, %27 : vector<8x32xf32>
    %c0_13 = arith.constant 0 : index
    %c0_14 = arith.constant 0 : index
    %29 = vector.load %arg2[%c0_13, %c0_14] : memref<8x32xf32, #tpu.memory_space<vmem>>, vector<8x32xf32>
    %30 = arith.addf %28, %29 : vector<8x32xf32>
    %c0_15 = arith.constant 0 : index
    %c0_16 = arith.constant 0 : index
    %31 = vector.load %arg6[%c0_15, %c0_16] : memref<8x32xf32, #tpu.memory_space<vmem>>, vector<8x32xf32>
    tpu.vector_store %arg6[%c0_15, %c0_16], %30 {strides = array<i32>} : memref<8x32xf32, #tpu.memory_space<vmem>>, vector<8x32xf32>,
    return
  }
  func.func @transform_0(%arg0: i32) -> (i32, i32) {
    %c0_i32 = arith.constant 0 : i32
    %c0_i32_0 = arith.constant 0 : i32
    %c0_i32_1 = arith.constant 0 : i32
    return %c0_i32, %c0_i32_0 : i32, i32
  }
  func.func @transform_1(%arg0: i32) -> (i32, i32) {
    %c0_i32 = arith.constant 0 : i32
    %c0_i32_0 = arith.constant 0 : i32
    return %c0_i32, %arg0 : i32, i32
  }
  func.func @transform_2(%arg0: i32) -> (i32, i32) {
    %c0_i32 = arith.constant 0 : i32
    %c0_i32_0 = arith.constant 0 : i32
    return %c0_i32, %arg0 : i32, i32
  }
  func.func @transform_3(%arg0: i32) -> (i32, i32) {
    %c0_i32 = arith.constant 0 : i32
    %c0_i32_0 = arith.constant 0 : i32
    return %c0_i32, %arg0 : i32, i32
  }
  func.func @transform_4(%arg0: i32) -> (i32, i32) {
    %c0_i32 = arith.constant 0 : i32
    %c0_i32_0 = arith.constant 0 : i32
    return %c0_i32, %arg0 : i32, i32
  }
  func.func @transform_5(%arg0: i32) -> (i32, i32) {
    %c0_i32 = arith.constant 0 : i32
    %c0_i32_0 = arith.constant 0 : i32
    return %c0_i32, %arg0 : i32, i32
  }
}

</mosaic_0001>

<bundles_post_ra>
// kernel: tpu_custom_call.1
= control target key start
LH: loop header
LB: loop body
LE: loop exit
PB: predicated region body
PF: predicated region fallthrough
CT: control target
= control target key end

     0   :  { %10 = vsyncpa [#allocation3], 0  ;;  %s327_s0 = inlined_call_operand.hbm [shape: f32[8,32], index: 0, kind: input, shape index: {}]   ;;  %s328_s1 = inlined_call_operand.hbm [shape: f32[8,32], index: 1, kind: input, shape index: {}]   ;;  %s329_s2 = inlined_call_operand.hbm [shape: f32[32,32], index: 2, kind: input, shape index: {}]   ;;  %s330_s3 = inlined_call_operand.vmem [shape: f32[1,32], index: 3, kind: input, shape index: {}]   ;;  %s331_s4 = inlined_call_operand.vmem [shape: f32[1,32], index: 4, kind: input, shape index: {}]   ;;  %s332_s5 = inlined_call_operand.hbm [shape: f32[8,32], index: 5, kind: output, shape index: {}]  }
   0x1   :  { %11 = vsyncpa [#allocation6], 0  ;;  %s29_s20 = sshll.u32 %s328_s1, 4  ;;  %s30_s20 = int_to_ptr.hbm [resolvable:$true] %s29_s20 }
   0x2   :  { %12 = vsyncpa [#allocation4], 0  ;;  %s269_s21 = smov [#allocation5]   ;;  %s18_s25 = sshll.u32 %s327_s0, 4  ;;  %s19_s25 = int_to_ptr.hbm [resolvable:$true] %s18_s25 }
   0x3   :  { %s31_s22 = sshll.u32 %s269_s21, 4  ;;  %s270_s26 = smov [#allocation2]   ;;  %s32_s22 = int_to_ptr.vmem [resolvable:$true] %s31_s22 }
   0x4   :  { %34 = dma.hbm_to_vmem [thread:$0]  %s30_s20, 128, %s32_s22, [#allocation6]  }
   0x5   :  { %s20_s27 = sshll.u32 %s270_s26, 4  ;;  %s39_s30 = sshll.u32 %s329_s2, 4  ;;  %s21_s27 = int_to_ptr.vmem [resolvable:$true] %s20_s27  ;;  %s40_s30 = int_to_ptr.hbm [resolvable:$true] %s39_s30 }
   0x6   :  { %23 = dma.hbm_to_vmem [thread:$0]  %s19_s25, 128, %s21_s27, [#allocation3]  }
   0x7   :  { %s271_s1 = smov [#allocation7]   ;;  %s272_s7 = smov 128  }
   0x8   :  { %s41_s6 = sshll.u32 %s271_s1, 4  ;;  %s273_s8 = smov 8   ;;  %s42_s6 = int_to_ptr.vmem [resolvable:$true] %s41_s6 }
   0x9   :  { %47 = dma.hbm_to_vmem [thread:$0]  %s40_s30, 512, %s42_s6, [#allocation6], %s272_s7, %s272_s7, %s273_s8  }
   0xa   :  { %263 = dma.done.wait [#allocation3], 128  }
   0xb   :  { %264 = vsyncadd [#allocation3], 4294967168 }
   0xc   :  { %265 = dma.done.wait [#allocation6], 640  }
   0xd   :  { %266 = vsyncadd [#allocation6], 4294966656  ;;  %v68_v0 = vld [vmem:[#allocation7 + $0x18] sm:$0xff]  ;;  %v67_v1 = vld [vmem:[#allocation7 + $0x10] sm:$0xff]  ;;  %vm69_vm0 = vcmask 261120   ;;  %s274_s11 = smov [#allocation8]  }
   0xe   :  { %85 = vmatpush.msra.mxu0 %v68_v0  ;;  %v66_v2 = vld [vmem:[#allocation7 + $0x8] sm:$0xff]  ;;  %v65_v3 = vld [vmem:[#allocation7] sm:$0xff]  ;;  %v64_v4 = vld [vmem:[#allocation2] sm:$0xff]  ;;  %s145_s12 = sshll.u32 %s274_s11, 4  ;;  %s147_s14 = sshll.u32 %s332_s5, 4  ;;  %s146_s12 = int_to_ptr.vmem [resolvable:$true] %s145_s12  ;;  %s148_s14 = int_to_ptr.hbm [resolvable:$true] %s147_s14 }
   0xf   :  { %v111_v30 = vld [vmem:[%s330_s3] sm:$0x1]  ;;  %v137_v42 = vld [vmem:[#allocation5] sm:$0xff] }
  0x10   :  { %86 = vmatpush.msra.mxu0 %v67_v1  ;;  %v124_v34 = vld [vmem:[%s331_s4] sm:$0x1] }
  0x12   :  { %87 = vmatpush.msra.mxu0 %v66_v2 }
  0x14   :  { %88 = vmatpush.msra.mxu0 %v65_v3 }
  0x15   :  { %158 = vmatmul.msk.f32.vlgmr.msra.gmra.mxu0 %vm69_vm0, %v64_v4 }
  0x92   :  { %v90_v5 = vpop.f32.mrf.mxu0 }
  0x93   :  { %v93_v6 = vsel %vm69_vm0, %v90_v5, 0.0 }
  0x94   :  { %v94_v7 = vrot.slane %v93_v6, 4 }
  0x96   :  { %v95_v8 = vadd.f32 %v94_v7, %v93_v6 }
  0x98   :  { %v96_v9 = vrot.slane %v95_v8, 2 }
  0x9a   :  { %v97_v10 = vadd.f32 %v96_v9, %v95_v8 }
  0x9c   :  { %v98_v11 = vrot.slane %v97_v10, 1 }
  0x9e   :  { %v99_v12 = vadd.f32 %v98_v11, %v97_v10 }
  0xa0   :  { %v100_v13 = vmul.f32 0.125, %v99_v12 }
  0xa2   :  { %v101_v14 = vsub.f32 %v90_v5, %v100_v13 }
  0xa4   :  { %v102_v15 = vmul.f32 %v101_v14, %v101_v14 }
  0xa6   :  { %v103_v16 = vsel %vm69_vm0, %v102_v15, 0.0 }
  0xa7   :  { %v104_v17 = vrot.slane %v103_v16, 4 }
  0xa9   :  { %v105_v18 = vadd.f32 %v104_v17, %v103_v16 }
  0xab   :  { %v106_v19 = vrot.slane %v105_v18, 2 }
  0xad   :  { %v107_v20 = vadd.f32 %v106_v19, %v105_v18 }
  0xaf   :  { %v108_v21 = vrot.slane %v107_v20, 1 }
  0xb1   :  { %v109_v22 = vadd.f32 %v108_v21, %v107_v20 }
  0xb3   :  { %v110_v23 = vmul.f32 0.125, %v109_v22 }
  0xb5   :  { %v112_v24 = vadd.f32 1e-05, %v110_v23 }
  0xb7   :  { %165 = vrsqrt.f32 %v112_v24  ;;  %vm119_vm2 = vweird.f32 %v112_v24 }
  0xbd   :  { %v166_v25 = vpop.eup %165 }
  0xbe   :  { %v114_v26 = vmul.f32 %v166_v25, %v112_v24  ;;  %vm120_vm1 = vweird.f32 %v166_v25 }
  0xbf   :  { %vm121_vm3 = vmor %vm119_vm2, %vm120_vm1 }
  0xc0   :  { %v115_v27 = vmul.f32 %v166_v25, %v114_v26 }
  0xc2   :  { %v116_v28 = vmul.f32 0.5, %v115_v27 }
  0xc4   :  { %v117_v29 = vsub.f32 1.5, %v116_v28 }
  0xc6   :  { %v118_v31 = vmul.f32 %v166_v25, %v117_v29 }
  0xc8   :  { %v122_v32 = vsel %vm121_vm3, %v166_v25, %v118_v31 }
  0xc9   :  { %v123_v33 = vmul.f32 %v122_v32, %v111_v30 }
  0xcb   :  { %v125_v35 = vmul.f32 %v123_v33, %v100_v13  ;;  %v128_v36 = vperm.slane %v123_v33, 0 }
  0xcd   :  { %v126_v37 = vsub.f32 %v124_v34, %v125_v35  ;;  %v130_v38 = vmul.f32 %v128_v36, %v90_v5 }
  0xcf   :  { %v132_v39 = vperm.slane %v126_v37, 0 }
  0xd1   :  { %v134_v40 = vadd.f32 %v132_v39, %v130_v38 }
  0xd3   :  { %v135_v41 = vmul.f32 0.01, %v134_v40 }
  0xd5   :  { %v136_v43 = vmax.f32 %v134_v40, %v135_v41 }
  0xd7   :  { %v138_v44 = vadd.f32 %v137_v42, %v136_v43 }
  0xd9   :  { %139 = vst.msk [vmem:[#allocation8] sm:$0xff] %vm69_vm0, %v138_v44 }
  0xda   :  { %150 = dma.vmem_to_hbm [thread:$0]  %s146_s12, 128, %s148_s14, [#allocation4]  }
  0xdb   :  { %267 = dma.done.wait [#allocation4], 128  }
  0xdc   :  { %268 = vsyncadd [#allocation4], 4294967168 }
  0xdd   :  { %155 = vsyncpa [#allocation3], 1 }
  0xde   :  { %156 = vsyncpa [#allocation6], 1 }
  0xdf   :  { %157 = vsyncpa [#allocation4], 1 }

</bundles_post_ra>
